<compile_context>
chip_gen: v7x
topology: tpu7x:2x2x1
jax: 0.10.0
libtpu: 0.0.40
codegen_flags: <defaults>
</compile_context>

<pallas_src>
import functools

import jax
import jax.numpy as jnp
from jax.experimental import pallas as pl
from jax.experimental.pallas import tpu as pltpu


_VMEM_LIMIT_BYTES = 48 * 1024 * 1024   # safe on v5e/v6e (128 MiB phys) and v7x (64 MiB phys)
_TARGET_BLOCK_BYTES = 4 << 20          # ~4 MiB per f32 block; <= _VMEM_LIMIT / 8 budget
                                       # (2x dbuf in + 2x dbuf out + ~2 blocks f32 scratch)


def _pow_alpha(x, alpha):
    """x ** alpha for x > 0, factored onto cheap units where possible."""
    if alpha == 1.0:
        return x
    if alpha == 0.5:
        return jnp.sqrt(x)
    if alpha == 0.25:
        return jnp.sqrt(jnp.sqrt(x))
    if alpha == 0.75:
        r = jnp.sqrt(x)
        return r * jnp.sqrt(r)
    if alpha == 1.5:
        return x * jnp.sqrt(x)
    if float(alpha).is_integer() and 2.0 <= alpha <= 4.0:
        n = int(alpha)
        y = x
        for _ in range(n - 1):
            y = y * x
        return y
    # Generic path (x > 0 guaranteed upstream by relu + eps): 2 EUP transcendentals.
    return jnp.exp(alpha * jnp.log(x))


def _power_norm_kernel(x_ref, o_ref, *, alpha, eps):
    # Block is (C, ...) with the channel (reduction) axis leading; the same body
    # handles both the (C, T) and (C, TS, 128) tilings.
    x = x_ref[...].astype(jnp.float32)
    x = jnp.maximum(x, 0.0) + eps          # relu + eps  (=> x >= eps > 0)
    x = jnp.minimum(x, 1.0e6)              # upper clamp (lower bound already eps)

    y = _pow_alpha(x, alpha)

    s = jnp.sum(y, axis=0, keepdims=True)  # reduce channels only -> (1, ...)
    # Exact reciprocal (approx=True would exceed the 1e-5 reference tolerance).
    inv = pl.reciprocal(s + eps)
    o_ref[...] = (y * inv).astype(o_ref.dtype)


def power_normalization(x, alpha=0.5, eps=1e-6):
    """x: (N, C, H, W) float array (NCHW, matching the PyTorch module)."""
    N, C, H, W = x.shape
    HW = H * W

    kernel = functools.partial(_power_norm_kernel, alpha=float(alpha), eps=float(eps))
    cparams = pltpu.CompilerParams(
        dimension_semantics=("parallel", "parallel"),
        vmem_limit_bytes=_VMEM_LIMIT_BYTES,
    )

    # Bytes of one 128-lane spatial slab holding all C channels (f32 compute).
    row_bytes = C * 128 * 4
    # TODO(synk): for extreme C (row_bytes >> block budget) split C onto a third
    # ("arbitrary") grid axis with a running channel sum; not needed for typical C.

    if HW % 128 == 0:
        # ---- Lane-dense path: (N, C, S, 128), block (C, TS, 128) ----
        S = HW // 128
        ts = max(1, _TARGET_BLOCK_BYTES // row_bytes)
        if ts >= S:
            ts = S                              # full extent (always a legal block dim)
        else:
            ts = max(8, (ts // 8) * 8)          # second-minor block dim: multiple of 8
            ts = min(ts, S)
        # Megacore: make sure there are >= 2 parallel blocks when the shape allows.
        if N == 1 and pl.cdiv(S, ts) == 1 and S > 8:
            ts = max(8, ((S // 2) // 8) * 8)

        # NOTE: for W a multiple of 128 this reshape is layout-preserving; otherwise
        # it may relayout once, which is still cheaper than pad + slice passes.
        x_r = x.reshape(N, C, S, 128)
        grid = (N, pl.cdiv(S, ts))

        out = pl.pallas_call(
            kernel,
            out_shape=jax.ShapeDtypeStruct((N, C, S, 128), x.dtype),
            grid_spec=pl.GridSpec(
                grid=grid,
                in_specs=[pl.BlockSpec((None, C, ts, 128), lambda n, h: (n, 0, h, 0))],
                out_specs=pl.BlockSpec((None, C, ts, 128), lambda n, h: (n, 0, h, 0)),
            ),
            compiler_params=cparams,
        )(x_r)
        return out.reshape(N, C, H, W)

    # ---- Fallback path: (N, C, HW), block (C, T); ragged last block masked ----
    t = max(128, (_TARGET_BLOCK_BYTES // (C * 4) // 128) * 128)
    hw_128 = pl.cdiv(HW, 128) * 128
    t = min(t, hw_128)
    # Megacore: >= 2 parallel blocks when the shape allows.
    if N == 1 and pl.cdiv(HW, t) == 1 and t > 128:
        t = max(128, pl.cdiv(HW // 2, 128) * 128)

    x_r = x.reshape(N, C, HW)
    grid = (N, pl.cdiv(HW, t))

    out = pl.pallas_call(
        kernel,
        out_shape=jax.ShapeDtypeStruct((N, C, HW), x.dtype),
        grid_spec=pl.GridSpec(
            grid=grid,
            in_specs=[pl.BlockSpec((None, C, t), lambda n, h: (n, 0, h))],
            out_specs=pl.BlockSpec((None, C, t), lambda n, h: (n, 0, h)),
        ),
        compiler_params=cparams,
    )(x_r)
    return out.reshape(N, C, H, W)


def _reference(x, alpha=0.5, eps=1e-6):
    x = jnp.maximum(x, 0.0) + eps
    x = jnp.clip(x, eps, 1.0e6)
    x = jnp.power(x, alpha)
    return x / (jnp.sum(x, axis=1, keepdims=True) + eps)


if __name__ == "__main__":
    key = jax.random.PRNGKey(0)

    # Primary case (matches the module's typical NCHW usage): lane-dense path.
    x = jax.random.normal(key, (2, 4, 16, 16), dtype=jnp.float32)
    out = jax.block_until_ready(power_normalization(x, alpha=0.5, eps=1e-6))
    ref = _reference(x, alpha=0.5, eps=1e-6)
    assert out.shape == x.shape
    assert jnp.allclose(out, ref, atol=1e-5, rtol=1e-5)

    # Secondary case: HW not a multiple of 128 -> ragged fallback path.
    x2 = jax.random.normal(jax.random.PRNGKey(1), (1, 8, 7, 9), dtype=jnp.float32)
    out2 = jax.block_until_ready(power_normalization(x2, alpha=0.5, eps=1e-6))
    ref2 = _reference(x2, alpha=0.5, eps=1e-6)
    assert out2.shape == x2.shape
    assert jnp.allclose(out2, ref2, atol=1e-5, rtol=1e-5)

    print("KERNEL_OK")
</pallas_src>

<mosaic_0001>
module attributes {stable_mosaic.version = 11 : i64} {
  func.func @_power_norm_kernel(%arg0: i32, %arg1: i32, %arg2: memref<1x4x2x128xf32, #tpu.memory_space<vmem>>, %arg3: memref<1x4x2x128xf32, #tpu.memory_space<vmem>>) attributes {dimension_semantics = [#tpu.dimension_semantics<parallel>, #tpu.dimension_semantics<parallel>], iteration_bounds = array<i64: 2, 1>, scalar_prefetch = 0 : i64, scratch_operands = 0 : i64, tpu.core_type = #tpu.core_type<tc>, window_params = [{transform_indices = @transform_0, window_bounds = array<i64: 1, 4, 2, 128>}, {transform_indices = @transform_1, window_bounds = array<i64: 1, 4, 2, 128>}]} {
    %c0 = arith.constant 0 : index
    %c0_0 = arith.constant 0 : index
    %c0_1 = arith.constant 0 : index
    %c0_2 = arith.constant 0 : index
    %0 = vector.load %arg2[%c0, %c0_0, %c0_1, %c0_2] : memref<1x4x2x128xf32, #tpu.memory_space<vmem>>, vector<1x4x2x128xf32>
    %1 = vector.shape_cast %0 : vector<1x4x2x128xf32> to vector<4x2x128xf32>
    %cst = arith.constant 0.000000e+00 : f32
    %2 = vector.broadcast %cst : f32 to vector<4x2x128xf32>
    %3 = arith.maximumf %1, %2 : vector<4x2x128xf32>
    %cst_3 = arith.constant 9.99999997E-7 : f32
    %4 = vector.broadcast %cst_3 : f32 to vector<4x2x128xf32>
    %5 = arith.addf %3, %4 : vector<4x2x128xf32>
    %cst_4 = arith.constant 1.000000e+06 : f32
    %6 = vector.broadcast %cst_4 : f32 to vector<4x2x128xf32>
    %7 = arith.minimumf %5, %6 : vector<4x2x128xf32>
    %8 = math.sqrt %7 : vector<4x2x128xf32>
    %cst_5 = arith.constant dense<0.000000e+00> : vector<2x128xf32>
    %9 = vector.multi_reduction <add>, %8, %cst_5 [0] : vector<4x2x128xf32> to vector<2x128xf32>
    %10 = vector.shape_cast %9 : vector<2x128xf32> to vector<1x2x128xf32>
    %cst_6 = arith.constant 9.99999997E-7 : f32
    %11 = vector.broadcast %cst_6 : f32 to vector<1x2x128xf32>
    %12 = arith.addf %10, %11 : vector<1x2x128xf32>
    %13 = tpu.reciprocal %12 : vector<1x2x128xf32> -> vector<1x2x128xf32>
    %14 = vector.broadcast %13 : vector<1x2x128xf32> to vector<4x2x128xf32>
    %15 = arith.mulf %8, %14 : vector<4x2x128xf32>
    %c0_7 = arith.constant 0 : index
    %c0_8 = arith.constant 0 : index
    %c0_9 = arith.constant 0 : index
    %c0_10 = arith.constant 0 : index
    %16 = vector.load %arg3[%c0_7, %c0_8, %c0_9, %c0_10] : memref<1x4x2x128xf32, #tpu.memory_space<vmem>>, vector<1x4x2x128xf32>
    %17 = vector.shape_cast %16 : vector<1x4x2x128xf32> to vector<4x2x128xf32>
    %18 = vector.shape_cast %15 : vector<4x2x128xf32> to vector<1x4x2x128xf32>
    tpu.vector_store %arg3[%c0_7, %c0_8, %c0_9, %c0_10], %18 {strides = array<i32>} : memref<1x4x2x128xf32, #tpu.memory_space<vmem>>, vector<1x4x2x128xf32>,
    return
  }
  func.func @transform_0(%arg0: i32, %arg1: i32) -> (i32, i32, i32, i32) {
    %c0_i32 = arith.constant 0 : i32
    %c0_i32_0 = arith.constant 0 : i32
    %c0_i32_1 = arith.constant 0 : i32
    return %arg0, %c0_i32, %arg1, %c0_i32_0 : i32, i32, i32, i32
  }
  func.func @transform_1(%arg0: i32, %arg1: i32) -> (i32, i32, i32, i32) {
    %c0_i32 = arith.constant 0 : i32
    %c0_i32_0 = arith.constant 0 : i32
    %c0_i32_1 = arith.constant 0 : i32
    return %arg0, %c0_i32, %arg1, %c0_i32_0 : i32, i32, i32, i32
  }
}

</mosaic_0001>

<bundles_post_ra>
// kernel: tpu_custom_call.1
= control target key start
LH: loop header
LB: loop body
LE: loop exit
PB: predicated region body
PF: predicated region fallthrough
CT: control target
= control target key end

     0   :  { %6 = vsyncpa [#allocation3], 0  ;;  %s722_s0 = inlined_call_operand.hbm [shape: f32[2,4,2,128], index: 0, kind: input, shape index: {}]   ;;  %s723_s1 = inlined_call_operand.hbm [shape: f32[2,4,2,128], index: 1, kind: output, shape index: {}]  }
   0x1   :  { %8 = vsyncpa [#allocation3 + $0x1], 0 }
   0x2   :  { %9 = vsyncpa [#allocation4], 0 }
   0x3   :  { %11 = vsyncpa [#allocation4 + $0x1], 0  ;;  %s537_s6 = smov 0   ;;  %s539_s7 = smov 0  }
   0x4   :  { %s541_s8 = smov 0   ;;  %s543_s9 = smov 0  }
   0x5   :  { %s545_s10 = smov 0   ;;  %s547_s11 = smov 0  }
   0x6 LB: > { %s314_s12 = sadd.s32 4294967295, %s519_s11   ;;  %s315_s13 = sadd.s32 4294967294, %s519_s11   ;;  %s519_s11 = sphi %s547_s11, %s17_s11   ;;  %s515_s10 = sphi %s545_s10, %s738_s10   ;;  %s511_s9 = sphi %s543_s9, %s737_s9   ;;  %s507_s8 = sphi %s541_s8, %s736_s8   ;;  %s503_s7 = sphi %s539_s7, %s735_s7   ;;  %s499_s6 = sphi %s537_s6, %s734_s6  }
   0x7   : > { %s29_s14 = sadd.s32 1, %s515_s10  ;;  %s38_s15 = sadd.s32 1, %s507_s8 }
   0x8   : > { %p31_p0 = scmp.ge.s32.totalorder %s29_s14, 2  ;;  %p45_p1 = scmp.ne.s32.totalorder %s507_s8, %s503_s7 }
   0x9   : > { %p46_p2 = scmp.eq.s32.totalorder %s519_s11, 0  ;;  %p51_p3 = scmp.ne.s32.totalorder %s503_s7, %s499_s6 }
   0xa   : > { %s740_s14 = smov (%p31_p0, %s29_s14), 0  ;;  %p52_p5 = scmp.eq.s32.totalorder %s314_s12, 0 }
   0xb   : > { %p578_p4 = por %p46_p2, %p45_p1  ;;  %s33_s17 = ssub.s32 %s515_s10, %s740_s14 }
   0xc   : > { %p77_p6 = scmp.eq.s32.totalorder %s314_s12, 1  ;;  %p36_p7 = scmp.eq.s32.totalorder %s33_s17, 0 }
   0xd   : > { %p584_p8 = por %p52_p5, %p51_p3  ;;  %p83_p10 = scmp.eq.s32.totalorder %s315_s13, 1 }
   0xe   : > { %p588_p9 = por %p77_p6, %p45_p1  ;;  %p343_p13 = scmp.lt.s32.totalorder %s519_s11, 2 }
   0xf   : > { %s593_s20 = scalar_select %p36_p7, %s507_s8, %s38_s15  }
  0x10   : > { %s727_s19 = scalar_select %p588_p9, 1, 0 }
  0x11   : > { %p595_p11 = por %p83_p10, %p51_p3  ;;  %s103_s22 = sand.u32 1, %s507_s8  }
  0x12   : > { %s318_s23 = sshll.u32 %s103_s22, 3  ;;  %s329_s24 = sshll.u32 %s515_s10, 7 }
  0x13   : > { %s728_s21 = scalar_select %p595_p11, 1, 0 }
  0x14   : > { %s606_s27 = scalar_lea.hbm %s722_s0, %s329_s24  ;;  %s107_s28 = scalar_lea.vmem [#allocation2], %s318_s23 }
  0x15   : > { %s115_s29 = sshll.u32 %s107_s28, 4  ;;  %p612_p0 = pnand %p343_p13, %p578_p4  ;;  %s608_s29 = int_to_ptr.vmem [resolvable:$true] %s115_s29 }
  0x16   : > { %s617_s2 = scalar_lea.sflag [#allocation3], %s103_s22  ;;  %s407_s3 = scalar_lea.hbm %s606_s27, 128 }
  0x17   : > { %p408_p2 = scmp.ne.s32.totalorder %s606_s27, %s407_s3  ;;  %p409_p3 = pneg %p612_p0 }
  0x18   : > { %s412_s12 = scalar_lea.hbm %s722_s0, 256  ;;  %p413_p4 = scmp.lt.u32.totalorder %s606_s27, %s722_s0 }
  0x19   : > { %p410_p5 = pnand %p409_p3, %p408_p2  ;;  %p414_p7 = scmp.lt.u32.totalorder %s412_s12, %s407_s3 }
  0x1a   : > { %p416_p13 = scmp.lt.u32.totalorder %s407_s3, %s606_s27 }
  0x1b   : > { %p411_p6 = pneg %p410_p5  ;;  %p415_p10 = por %p414_p7, %p413_p4 }
  0x1d   : > { %p417_p12 = por %p416_p13, %p415_p10 }
  0x1f   : > { %p418_p1 = pnand %p417_p12, %p411_p6 }
  0x21   : > { %421 = shalt.err (!%p418_p1)
}
  0x22   : > { %s422_s16 = scalar_lea.vmem %s608_s29, 128  ;;  %s521_s17 = smov [#allocation2]  }
  0x23   : > { %p423_p2 = scmp.ne.s32.totalorder %s608_s29, %s422_s16  ;;  %s427_s22 = sshll.u32 %s521_s17, 4  ;;  %s428_s22 = int_to_ptr.vmem [resolvable:$false] %s427_s22 }
  0x24   : > { %s429_s23 = scalar_lea.vmem %s428_s22, 256  ;;  %p430_p9 = scmp.lt.s32.totalorder %s608_s29, %s428_s22 }
  0x25   : > { %p425_p5 = pnand %p423_p2, %p409_p3  ;;  %p431_p4 = scmp.lt.s32.totalorder %s429_s23, %s422_s16 }
  0x27   : > { %p426_p11 = pneg %p425_p5  ;;  %p432_p7 = por %p431_p4, %p430_p9 }
  0x29   : > { %p433_p10 = pnand %p432_p7, %p426_p11 }
  0x2b   : > { %436 = shalt.err (!%p433_p10)
}
  0x2c   : > { %s522_s24 = smov 32   ;;  %s523_s25 = smov 2  }
  0x2d   : > { %338 = dma.hbm_to_vmem [thread:$0]  (!%p612_p0), %s606_s27, 128, %s608_s29, %s617_s2, %s522_s24, %s522_s24, %s523_s25  }
  0x2e   : > { %p123_p12 = scmp.lt.s32.totalorder %s519_s11, 3  ;;  %p730_p1 = scmp.ge.s32.totalorder %s519_s11, 1 }
  0x30   : > { %p124_p3 = pnand %p730_p1, %p123_p12 }
  0x31   : > { %s649_s26 = sand.u32 (!%p124_p3), 1, %s503_s7  }
  0x32   : > { %127 = sbr.rel (%p124_p3) target bundleno = 119 (0x77), region = 24  ;;  %s322_s28 = sshll.u32 (!%p124_p3), %s649_s26, 3 }
  0x33   : > { %s130_s3 = scalar_lea.sflag (!%p124_p3), [#allocation3], %s649_s26  ;;  %s133_s4 = scalar_lea.vmem (!%p124_p3), [#allocation2], %s322_s28 }
  0x39   : > { %490 = dma.done.wait (%p584_p8), %s130_s3, 128  }
  0x3a   : > { %492 = vsyncadd (%p584_p8), %s130_s3, 4294967168  ;;  %v152_v0 = vld [vmem:[%s133_s4] sm:$0x3]  ;;  %v153_v1 = vld [vmem:[%s133_s4 + $0x2] sm:$0x3]  ;;  %vm196_vm2 = vcmask 1041408  }
  0x3b   : > { %v154_v2 = vld [vmem:[%s133_s4 + $0x4] sm:$0x3]  ;;  %v155_v3 = vld [vmem:[%s133_s4 + $0x6] sm:$0x3]  ;;  %v156_v4 = vmax.f32 %v152_v0, 0.0  ;;  %v157_v5 = vmax.f32 %v153_v1, 0.0 }
  0x3c   : > { %v158_v6 = vmax.f32 %v154_v2, 0.0  ;;  %v159_v7 = vmax.f32 %v155_v3, 0.0  ;;  %s151_s18 = scalar_lea.vmem [#allocation5], %s322_s28  ;;  %s330_s29 = sshll.u32 %s511_s9, 7 }
  0x3d   : > { %v160_v8 = vadd.f32 1e-06, %v156_v4  ;;  %v161_v9 = vadd.f32 1e-06, %v157_v5  ;;  %s229_s27 = sshll.u32 %s151_s18, 4  ;;  %s673_s5 = scalar_lea.hbm %s723_s1, %s330_s29  ;;  %s668_s27 = int_to_ptr.vmem [resolvable:$true] %s229_s27 }
  0x3e   : > { %v162_v10 = vadd.f32 1e-06, %v158_v6  ;;  %v163_v11 = vadd.f32 1e-06, %v159_v7  ;;  %s215_s9 = scalar_lea.sflag [#allocation4], %s649_s26  ;;  %s437_s12 = scalar_lea.vmem %s668_s27, 128 }
  0x3f   : > { %v164_v12 = vmin.f32 %v160_v8, 1000000.0  ;;  %v165_v13 = vmin.f32 %v161_v9, 1000000.0  ;;  %p438_p8 = scmp.ne.s32.totalorder %s668_s27, %s437_s12  ;;  %p731_p9 = scmp.ne.s32.totalorder %s727_s19, 0 }
  0x40   : > { %v166_v14 = vmin.f32 %v162_v10, 1000000.0  ;;  %v167_v15 = vmin.f32 %v163_v11, 1000000.0  ;;  %s524_s13 = smov [#allocation5]  }
  0x41   : > { %397 = vrsqrt.f32 %v164_v12  ;;  %vm170_vm0 = vcmp.eq.f32.partialorder %v164_v12, inf  ;;  %vm172_vm1 = vcmp.eq.f32.partialorder %v164_v12, 0.0  ;;  %v173_v17 = vand.u32 2147483648, %v164_v12  ;;  %p439_p11 = pnand %p438_p8, %p731_p9  ;;  %s441_s15 = sshll.u32 %s524_s13, 4  ;;  %s442_s15 = int_to_ptr.vmem [resolvable:$false] %s441_s15 }
  0x42   : > { %399 = vrsqrt.f32 %v165_v13  ;;  %vm177_vm3 = vcmp.eq.f32.partialorder %v165_v13, inf  ;;  %vm179_vm4 = vcmp.eq.f32.partialorder %v165_v13, 0.0  ;;  %v180_v20 = vand.u32 2147483648, %v165_v13  ;;  %s443_s16 = scalar_lea.vmem %s442_s15, 256  ;;  %p444_p6 = scmp.lt.s32.totalorder %s668_s27, %s442_s15 }
  0x43   : > { %401 = vrsqrt.f32 %v166_v14  ;;  %vm184_vm5 = vcmp.eq.f32.partialorder %v166_v14, inf  ;;  %vm186_vm6 = vcmp.eq.f32.partialorder %v166_v14, 0.0  ;;  %v187_v23 = vand.u32 2147483648, %v166_v14  ;;  %p440_p0 = pneg %p439_p11  ;;  %p445_p13 = scmp.lt.s32.totalorder %s443_s16, %s437_s12 }
  0x44   : > { %403 = vrsqrt.f32 %v167_v15  ;;  %vm191_vm7 = vcmp.eq.f32.partialorder %v167_v15, inf  ;;  %v194_v27 = vand.u32 2147483648, %v167_v15  ;;  %vm193_vm8 = vcmp.eq.f32.partialorder %v167_v15, 0.0 }
  0x45   : > { %p446_p2 = por %p445_p13, %p444_p6 }
  0x47   : > { %p447_p5 = pnand %p446_p2, %p440_p0 }
  0x4b   : > { %v398_v16 = vpop.eup %397 }
  0x4c   : > { %v400_v18 = vpop.eup %399  ;;  %v169_v19 = vmul.f32 %v398_v16, %v164_v12 }
  0x4d   : > { %v402_v21 = vpop.eup %401  ;;  %v176_v22 = vmul.f32 %v400_v18, %v165_v13 }
  0x4e   : > { %v404_v24 = vpop.eup %403  ;;  %v171_v25 = vsel %vm170_vm0, %v164_v12, %v169_v19  ;;  %v183_v26 = vmul.f32 %v402_v21, %v166_v14 }
  0x4f   : > { %v174_v28 = vsel %vm172_vm1, %v173_v17, %v171_v25  ;;  %v178_v29 = vsel %vm177_vm3, %v165_v13, %v176_v22  ;;  %v190_v30 = vmul.f32 %v404_v24, %v167_v15 }
  0x50   : > { %v181_v31 = vsel %vm179_vm4, %v180_v20, %v178_v29  ;;  %v185_v32 = vsel %vm184_vm5, %v166_v14, %v183_v26  ;;  %v197_v33 = vsel %vm196_vm2, %v174_v28, 0.0 }
  0x51   : > { %v188_v34 = vsel %vm186_vm6, %v187_v23, %v185_v32  ;;  %v192_v35 = vsel %vm191_vm7, %v167_v15, %v190_v30  ;;  %v198_v36 = vsel %vm196_vm2, %v181_v31, 0.0 }
  0x52   : > { %v195_v37 = vsel %vm193_vm8, %v194_v27, %v192_v35  ;;  %v199_v38 = vadd.f32 %v198_v36, %v197_v33  ;;  %v200_v39 = vsel %vm196_vm2, %v188_v34, 0.0 }
  0x53   : > { %v202_v40 = vsel %vm196_vm2, %v195_v37, 0.0 }
  0x54   : > { %v201_v41 = vadd.f32 %v200_v39, %v199_v38 }
  0x56   : > { %v203_v42 = vadd.f32 %v202_v40, %v201_v41 }
  0x58   : > { %v204_v43 = vadd.f32 1e-06, %v203_v42 }
  0x5a   : > { %405 = vrcp.f32 %v204_v43 }
  0x64   : > { %v406_v44 = vpop.eup %405 }
  0x65   : > { %v206_v45 = vmul.f32 %v406_v44, %v174_v28  ;;  %v207_v46 = vmul.f32 %v406_v44, %v181_v31  ;;  %v208_v47 = vmul.f32 %v406_v44, %v188_v34  ;;  %v209_v48 = vmul.f32 %v406_v44, %v195_v37 }
  0x67   : > { %210 = vst [vmem:[%s151_s18] sm:$0x3] %v206_v45  ;;  %211 = vst [vmem:[%s151_s18 + $0x2] sm:$0x3] %v207_v46 }
  0x68   : > { %212 = vst [vmem:[%s151_s18 + $0x4] sm:$0x3] %v208_v47  ;;  %213 = vst [vmem:[%s151_s18 + $0x6] sm:$0x3] %v209_v48 }
  0x69   : > { %450 = shalt.err (!%p447_p5)
}
  0x6a   : > { %s451_s17 = scalar_lea.hbm %s673_s5, 128  ;;  %s455_s24 = scalar_lea.hbm %s723_s1, 256 }
  0x6b   : > { %p452_p4 = scmp.ne.s32.totalorder %s673_s5, %s451_s17  ;;  %p456_p12 = scmp.lt.u32.totalorder %s673_s5, %s723_s1 }
  0x6c   : > { %p457_p1 = scmp.lt.u32.totalorder %s455_s24, %s451_s17  ;;  %p459_p8 = scmp.lt.u32.totalorder %s451_s17, %s673_s5 }
  0x6d   : > { %p453_p7 = pnand %p452_p4, %p731_p9 }
  0x6e   : > { %p458_p3 = por %p457_p1, %p456_p12 }
  0x6f   : > { %p454_p10 = pneg %p453_p7 }
  0x70   : > { %p460_p11 = por %p459_p8, %p458_p3 }
  0x72   : > { %p461_p0 = pnand %p460_p11, %p454_p10 }
  0x74   : > { %464 = shalt.err (!%p461_p0)
}
  0x75   : > { %s525_s3 = smov 32   ;;  %s526_s4 = smov 2  }
  0x76   : > { %333 = dma.vmem_to_hbm [thread:$0]  (%p731_p9), %s668_s27, 128, %s673_s5, %s215_s9, %s525_s3, %s525_s3, %s526_s4  }
  0x77 PF: > { %s244_s18 = sand.u32 1, %s499_s6   ;;  %p732_p6 = scmp.ne.s32.totalorder %s728_s21, 0 }
  0x78   : > { %p733_p13 = scmp.ge.s32.totalorder %s519_s11, 2  ;;  %s245_s29 = scalar_lea.sflag [#allocation4], %s244_s18 }
  0x7a   : > { %p340_p2 = pnand %p733_p13, %p732_p6 }
  0x7c   : > { %494 = dma.done.wait (!%p340_p2), %s245_s29, 128  }
  0x7d   : > { %496 = vsyncadd (!%p340_p2), %s245_s29, 4294967168  ;;  %s17_s11 = sadd.s32 1, %s519_s11   ;;  %s734_s6 = smov %s503_s7 }
  0x7e   : > { %p14_p5 = scmp.ge.s32.totalorder %s17_s11, 4   ;;  %s735_s7 = smov %s507_s8 }
  0x7f   : > { %s736_s8 = smov %s593_s20  ;;  %s737_s9 = smov %s515_s10 }
  0x80   : > { %s738_s10 = smov %s740_s14  ;;  %16 = sbr.rel (!%p14_p5) target bundleno = 6 (0x6), region = 69 }
  0x87   :  { %250 = vsyncpa [#allocation3], 1 }
  0x88   :  { %252 = vsyncpa [#allocation3 + $0x1], 1 }
  0x89   :  { %253 = vsyncpa [#allocation4], 1 }
  0x8a   :  { %255 = vsyncpa [#allocation4 + $0x1], 1 }

</bundles_post_ra>
